<compile_context>
chip_gen: v7x
topology: tpu7x:2x2x1
jax: 0.10.0
libtpu: 0.0.40
codegen_flags: <defaults>
</compile_context>

<pallas_src>
import functools

import jax
import jax.numpy as jnp
from jax.experimental import pallas as pl
from jax.experimental.pallas import tpu as pltpu


def _matvec_scale_kernel(a_ref, b_ref, alpha_ref, o_ref, acc_ref, *, n_chunks):
    # Grid = (M_pad // tm, K_pad // tk); axis 1 is the K reduction ("arbitrary").
    k = pl.program_id(1)

    @pl.when(k == 0)
    def _():
        acc_ref[...] = jnp.zeros_like(acc_ref)

    # VPU multiply-accumulate over static, aligned 128-lane chunks of the
    # (tm, tk) A tile into a lane-dense (tm, 128) accumulator carried in vregs
    # for the duration of this grid step.  No MXU, no per-step XLU reduce,
    # no dynamic slice starts.
    acc = acc_ref[...]
    for c in range(n_chunks):
        sl = pl.ds(c * 128, 128)
        a_c = a_ref[:, sl].astype(jnp.float32)        # (tm, 128)
        b_c = b_ref[:, sl].astype(jnp.float32)        # (1, 128) -> row bcast
        acc = acc + a_c * b_c
    acc_ref[...] = acc

    @pl.when(k == pl.num_programs(1) - 1)
    def _():
        # One cross-lane (XLU) reduce per M tile + fused alpha scale.
        total = jnp.sum(acc_ref[...], axis=1, keepdims=True)    # (tm, 1) f32
        o_ref[...] = (total * alpha_ref[0]).astype(o_ref.dtype)


def _round_up(x: int, m: int) -> int:
    return ((x + m - 1) // m) * m


def _largest_divisor_tile(size: int, unit: int, target: int):
    """Largest multiple of `unit` that divides `size` and is <= target (or None)."""
    t = (min(target, size) // unit) * unit
    while t >= unit:
        if size % t == 0:
            return t
        t -= unit
    return None


def matvec_scale(A: jax.Array, B: jax.Array, alpha: float = 1.0) -> jax.Array:
    """Computes (A @ B) * alpha for A: (M, K), B: (K, 1) -> (M, 1)."""
    M, K = A.shape
    Kb, one = B.shape
    assert Kb == K and one == 1

    itemsize = jnp.dtype(A.dtype).itemsize
    sub = max(8, 32 // itemsize)   # sublane multiple: 8 f32, 16 bf16, 32 int8/fp8

    # --- M tiling: target tm = 128 so any M >= 256 yields >= 2 M tiles and the
    # "parallel" axis can shard across both TensorCores on v7x. ---
    M_pad = _round_up(M, sub)
    if M_pad <= 128:
        tm = M_pad
    else:
        tm = _largest_divisor_tile(M_pad, sub, 128)
        if tm is None or tm < 4 * sub:
            # No decent divisor: pad M up to the tile instead of shrinking it.
            M_pad = _round_up(M, 128)
            tm = 128

    # --- K tiling: target tk = 8192 (4 MiB f32 A tile, double-buffered 8 MiB,
    # safely under every generation's default scoped-VMEM limit).  Prefer a
    # large divisor of the 128-padded K; otherwise pad K up to the tile so the
    # kernel never falls back to skinny 128-wide tiles. ---
    K_pad = _round_up(K, 128)
    if K_pad <= 8192:
        tk = K_pad
    else:
        tk = _largest_divisor_tile(K_pad, 128, 8192)
        if tk is None or tk < 2048:
            tk = 8192
            K_pad = _round_up(K, tk)

    # Zero padding does not change the matvec result.
    A_p = A if (M_pad, K_pad) == (M, K) else jnp.pad(
        A, ((0, M_pad - M), (0, K_pad - K)))
    B_row = B.reshape(1, K)                    # lane-dense layout for B
    if K_pad != K:
        B_row = jnp.pad(B_row, ((0, 0), (0, K_pad - K)))
    alpha_arr = jnp.full((1,), alpha, dtype=jnp.float32)

    kernel = functools.partial(_matvec_scale_kernel, n_chunks=tk // 128)

    out = pl.pallas_call(
        kernel,
        out_shape=jax.ShapeDtypeStruct((M_pad, 1), A.dtype),
        grid_spec=pltpu.PrefetchScalarGridSpec(
            num_scalar_prefetch=0,
            grid=(M_pad // tm, K_pad // tk),
            in_specs=[
                pl.BlockSpec((tm, tk), lambda i, k: (i, k)),        # A tile
                pl.BlockSpec((1, tk), lambda i, k: (0, k)),         # B row chunk
                pl.BlockSpec(memory_space=pltpu.MemorySpace.SMEM),  # alpha
            ],
            out_specs=pl.BlockSpec((tm, 1), lambda i, k: (i, 0)),
            scratch_shapes=[pltpu.VMEM((tm, 128), jnp.float32)],
        ),
        compiler_params=pltpu.CompilerParams(
            dimension_semantics=("parallel", "arbitrary"),
            vmem_limit_bytes=32 * 1024 * 1024,
        ),
        cost_estimate=pl.CostEstimate(
            flops=2 * M_pad * K_pad,
            transcendentals=0,
            bytes_accessed=M_pad * K_pad * itemsize
            + (M_pad // tm) * K_pad * B.dtype.itemsize
            + M_pad * itemsize,
        ),
    )(A_p, B_row, alpha_arr)

    return out[:M] if M_pad != M else out


if __name__ == "__main__":
    key = jax.random.PRNGKey(0)
    k_a, k_b, k_c, k_d, k_e, k_f = jax.random.split(key, 6)

    # Small, TPU-friendly demo shapes (real benchmark shape is M=256, K=131072).
    M, K = 256, 1024
    A = jax.random.normal(k_a, (M, K), dtype=jnp.float32)
    B = jax.random.normal(k_b, (K, 1), dtype=jnp.float32)
    alpha = 2.5

    out = jax.block_until_ready(matvec_scale(A, B, alpha))
    ref = jnp.matmul(A, B, precision=jax.lax.Precision.HIGHEST) * alpha
    assert out.shape == (M, 1)
    assert jnp.allclose(out, ref, atol=1e-3, rtol=1e-4), "mismatch vs reference"

    # alpha == 1.0 path (pure matvec, as in the PyTorch module).
    out1 = jax.block_until_ready(matvec_scale(A, B, 1.0))
    ref1 = jnp.matmul(A, B, precision=jax.lax.Precision.HIGHEST)
    assert jnp.allclose(out1, ref1, atol=1e-3, rtol=1e-4)

    # Ragged shapes exercise the zero-padding path.
    M2, K2 = 52, 200
    A2 = jax.random.normal(k_c, (M2, K2), dtype=jnp.float32)
    B2 = jax.random.normal(k_d, (K2, 1), dtype=jnp.float32)
    out2 = jax.block_until_ready(matvec_scale(A2, B2, 0.5))
    ref2 = jnp.matmul(A2, B2, precision=jax.lax.Precision.HIGHEST) * 0.5
    assert out2.shape == (M2, 1)
    assert jnp.allclose(out2, ref2, atol=1e-3, rtol=1e-4)

    # Multi-K-step accumulation path (K_pad > tk), still modest in size.
    M3, K3 = 64, 12288
    A3 = jax.random.normal(k_e, (M3, K3), dtype=jnp.float32)
    B3 = jax.random.normal(k_f, (K3, 1), dtype=jnp.float32)
    out3 = jax.block_until_ready(matvec_scale(A3, B3, 1.0))
    ref3 = jnp.matmul(A3, B3, precision=jax.lax.Precision.HIGHEST)
    assert out3.shape == (M3, 1)
    assert jnp.allclose(out3, ref3, atol=1e-2, rtol=1e-4)

    print("KERNEL_OK")
</pallas_src>

<mosaic_0001>
module attributes {stable_mosaic.version = 11 : i64} {
  func.func @_matvec_scale_kernel(%arg0: i32, %arg1: i32, %arg2: memref<128x1024xf32, #tpu.memory_space<vmem>>, %arg3: memref<1x1024xf32, #tpu.memory_space<vmem>>, %arg4: memref<1xf32, #tpu.memory_space<smem>>, %arg5: memref<128x1xf32, #tpu.memory_space<vmem>>, %arg6: memref<128x128xf32, #tpu.memory_space<vmem>>) attributes {dimension_semantics = [#tpu.dimension_semantics<parallel>, #tpu.dimension_semantics<arbitrary>], iteration_bounds = array<i64: 2, 1>, scalar_prefetch = 0 : i64, scratch_operands = 1 : i64, tpu.core_type = #tpu.core_type<tc>, window_params = [{transform_indices = @transform_0, window_bounds = array<i64: 128, 1024>}, {transform_indices = @transform_1, window_bounds = array<i64: 1, 1024>}, {transform_indices = @transform_2, window_bounds = array<i64: 1>}, {transform_indices = @transform_3, window_bounds = array<i64: 128, 1>}]} {
    %c0_i32 = arith.constant 0 : i32
    %0 = arith.cmpi eq, %arg1, %c0_i32 : i32
    %1 = arith.extui %0 : i1 to i32
    %c0_i32_0 = arith.constant 0 : i32
    %2 = arith.cmpi ne, %1, %c0_i32_0 : i32
    scf.if %2 {
      %cst = arith.constant 0.000000e+00 : f32
      %48 = vector.broadcast %cst : f32 to vector<128x128xf32>
      %c0_31 = arith.constant 0 : index
      %c0_32 = arith.constant 0 : index
      %49 = vector.load %arg6[%c0_31, %c0_32] : memref<128x128xf32, #tpu.memory_space<vmem>>, vector<128x128xf32>
      tpu.vector_store %arg6[%c0_31, %c0_32], %48 {strides = array<i32>} : memref<128x128xf32, #tpu.memory_space<vmem>>, vector<128x128xf32>,
    } else {
    }
    %c0 = arith.constant 0 : index
    %c0_1 = arith.constant 0 : index
    %3 = vector.load %arg6[%c0, %c0_1] : memref<128x128xf32, #tpu.memory_space<vmem>>, vector<128x128xf32>
    %c0_2 = arith.constant 0 : index
    %c0_3 = arith.constant 0 : index
    %4 = vector.load %arg2[%c0_2, %c0_3] : memref<128x1024xf32, #tpu.memory_space<vmem>>, vector<128x128xf32>
    %c0_4 = arith.constant 0 : index
    %c0_5 = arith.constant 0 : index
    %5 = vector.load %arg3[%c0_4, %c0_5] : memref<1x1024xf32, #tpu.memory_space<vmem>>, vector<1x128xf32>
    %6 = vector.broadcast %5 : vector<1x128xf32> to vector<128x128xf32>
    %7 = arith.mulf %4, %6 : vector<128x128xf32>
    %8 = arith.addf %3, %7 : vector<128x128xf32>
    %c0_6 = arith.constant 0 : index
    %c128 = arith.constant 128 : index
    %9 = vector.load %arg2[%c0_6, %c128] : memref<128x1024xf32, #tpu.memory_space<vmem>>, vector<128x128xf32>
    %c0_7 = arith.constant 0 : index
    %c128_8 = arith.constant 128 : index
    %10 = vector.load %arg3[%c0_7, %c128_8] : memref<1x1024xf32, #tpu.memory_space<vmem>>, vector<1x128xf32>
    %11 = vector.broadcast %10 : vector<1x128xf32> to vector<128x128xf32>
    %12 = arith.mulf %9, %11 : vector<128x128xf32>
    %13 = arith.addf %8, %12 : vector<128x128xf32>
    %c0_9 = arith.constant 0 : index
    %c256 = arith.constant 256 : index
    %14 = vector.load %arg2[%c0_9, %c256] : memref<128x1024xf32, #tpu.memory_space<vmem>>, vector<128x128xf32>
    %c0_10 = arith.constant 0 : index
    %c256_11 = arith.constant 256 : index
    %15 = vector.load %arg3[%c0_10, %c256_11] : memref<1x1024xf32, #tpu.memory_space<vmem>>, vector<1x128xf32>
    %16 = vector.broadcast %15 : vector<1x128xf32> to vector<128x128xf32>
    %17 = arith.mulf %14, %16 : vector<128x128xf32>
    %18 = arith.addf %13, %17 : vector<128x128xf32>
    %c0_12 = arith.constant 0 : index
    %c384 = arith.constant 384 : index
    %19 = vector.load %arg2[%c0_12, %c384] : memref<128x1024xf32, #tpu.memory_space<vmem>>, vector<128x128xf32>
    %c0_13 = arith.constant 0 : index
    %c384_14 = arith.constant 384 : index
    %20 = vector.load %arg3[%c0_13, %c384_14] : memref<1x1024xf32, #tpu.memory_space<vmem>>, vector<1x128xf32>
    %21 = vector.broadcast %20 : vector<1x128xf32> to vector<128x128xf32>
    %22 = arith.mulf %19, %21 : vector<128x128xf32>
    %23 = arith.addf %18, %22 : vector<128x128xf32>
    %c0_15 = arith.constant 0 : index
    %c512 = arith.constant 512 : index
    %24 = vector.load %arg2[%c0_15, %c512] : memref<128x1024xf32, #tpu.memory_space<vmem>>, vector<128x128xf32>
    %c0_16 = arith.constant 0 : index
    %c512_17 = arith.constant 512 : index
    %25 = vector.load %arg3[%c0_16, %c512_17] : memref<1x1024xf32, #tpu.memory_space<vmem>>, vector<1x128xf32>
    %26 = vector.broadcast %25 : vector<1x128xf32> to vector<128x128xf32>
    %27 = arith.mulf %24, %26 : vector<128x128xf32>
    %28 = arith.addf %23, %27 : vector<128x128xf32>
    %c0_18 = arith.constant 0 : index
    %c640 = arith.constant 640 : index
    %29 = vector.load %arg2[%c0_18, %c640] : memref<128x1024xf32, #tpu.memory_space<vmem>>, vector<128x128xf32>
    %c0_19 = arith.constant 0 : index
    %c640_20 = arith.constant 640 : index
    %30 = vector.load %arg3[%c0_19, %c640_20] : memref<1x1024xf32, #tpu.memory_space<vmem>>, vector<1x128xf32>
    %31 = vector.broadcast %30 : vector<1x128xf32> to vector<128x128xf32>
    %32 = arith.mulf %29, %31 : vector<128x128xf32>
    %33 = arith.addf %28, %32 : vector<128x128xf32>
    %c0_21 = arith.constant 0 : index
    %c768 = arith.constant 768 : index
    %34 = vector.load %arg2[%c0_21, %c768] : memref<128x1024xf32, #tpu.memory_space<vmem>>, vector<128x128xf32>
    %c0_22 = arith.constant 0 : index
    %c768_23 = arith.constant 768 : index
    %35 = vector.load %arg3[%c0_22, %c768_23] : memref<1x1024xf32, #tpu.memory_space<vmem>>, vector<1x128xf32>
    %36 = vector.broadcast %35 : vector<1x128xf32> to vector<128x128xf32>
    %37 = arith.mulf %34, %36 : vector<128x128xf32>
    %38 = arith.addf %33, %37 : vector<128x128xf32>
    %c0_24 = arith.constant 0 : index
    %c896 = arith.constant 896 : index
    %39 = vector.load %arg2[%c0_24, %c896] : memref<128x1024xf32, #tpu.memory_space<vmem>>, vector<128x128xf32>
    %c0_25 = arith.constant 0 : index
    %c896_26 = arith.constant 896 : index
    %40 = vector.load %arg3[%c0_25, %c896_26] : memref<1x1024xf32, #tpu.memory_space<vmem>>, vector<1x128xf32>
    %41 = vector.broadcast %40 : vector<1x128xf32> to vector<128x128xf32>
    %42 = arith.mulf %39, %41 : vector<128x128xf32>
    %43 = arith.addf %38, %42 : vector<128x128xf32>
    %c0_27 = arith.constant 0 : index
    %c0_28 = arith.constant 0 : index
    %44 = vector.load %arg6[%c0_27, %c0_28] : memref<128x128xf32, #tpu.memory_space<vmem>>, vector<128x128xf32>
    tpu.vector_store %arg6[%c0_27, %c0_28], %43 {strides = array<i32>} : memref<128x128xf32, #tpu.memory_space<vmem>>, vector<128x128xf32>,
    %c0_i32_29 = arith.constant 0 : i32
    %45 = arith.cmpi eq, %arg1, %c0_i32_29 : i32
    %46 = arith.extui %45 : i1 to i32
    %c0_i32_30 = arith.constant 0 : i32
    %47 = arith.cmpi ne, %46, %c0_i32_30 : i32
    scf.if %47 {
      %c0_31 = arith.constant 0 : index
      %c0_32 = arith.constant 0 : index
      %48 = vector.load %arg6[%c0_31, %c0_32] : memref<128x128xf32, #tpu.memory_space<vmem>>, vector<128x128xf32>
      %cst = arith.constant dense<0.000000e+00> : vector<128xf32>
      %49 = vector.multi_reduction <add>, %48, %cst [1] : vector<128x128xf32> to vector<128xf32>
      %50 = vector.shape_cast %49 : vector<128xf32> to vector<128x1xf32>
      %c0_33 = arith.constant 0 : index
      %51 = memref.load %arg4[%c0_33] : memref<1xf32, #tpu.memory_space<smem>>
      %52 = vector.broadcast %51 : f32 to vector<128x1xf32>
      %53 = arith.mulf %50, %52 : vector<128x1xf32>
      %c0_34 = arith.constant 0 : index
      %c0_35 = arith.constant 0 : index
      %54 = vector.load %arg5[%c0_34, %c0_35] : memref<128x1xf32, #tpu.memory_space<vmem>>, vector<128x1xf32>
      tpu.vector_store %arg5[%c0_34, %c0_35], %53 {strides = array<i32>} : memref<128x1xf32, #tpu.memory_space<vmem>>, vector<128x1xf32>,
    } else {
    }
    return
  }
  func.func @transform_0(%arg0: i32, %arg1: i32) -> (i32, i32) {
    %c0_i32 = arith.constant 0 : i32
    return %arg0, %arg1 : i32, i32
  }
  func.func @transform_1(%arg0: i32, %arg1: i32) -> (i32, i32) {
    %c0_i32 = arith.constant 0 : i32
    %c0_i32_0 = arith.constant 0 : i32
    return %c0_i32, %arg1 : i32, i32
  }
  func.func @transform_2(%arg0: i32, %arg1: i32) -> i32 {
    %c0_i32 = arith.constant 0 : i32
    %c0_i32_0 = arith.constant 0 : i32
    return %c0_i32 : i32
  }
  func.func @transform_3(%arg0: i32, %arg1: i32) -> (i32, i32) {
    %c0_i32 = arith.constant 0 : i32
    %c0_i32_0 = arith.constant 0 : i32
    return %arg0, %c0_i32 : i32, i32
  }
}

</mosaic_0001>

<bundles_post_ra>
// kernel: tpu_custom_call.1
= control target key start
LH: loop header
LB: loop body
LE: loop exit
PB: predicated region body
PF: predicated region fallthrough
CT: control target
= control target key end

     0   :  { %s1615_s0 = inlined_call_operand.hbm [shape: f32[256,1024], index: 0, kind: input, shape index: {}]   ;;  %s1616_s1 = inlined_call_operand.hbm [shape: f32[1,1024], index: 1, kind: input, shape index: {}]   ;;  %s1617_s2 = inlined_call_operand.<no memory space> [shape: f32[1], index: 2, kind: input, shape index: {}]   ;;  %s1618_s3 = inlined_call_operand.vmem [shape: f32[256,1], index: 3, kind: output, shape index: {}]  }
   0x1   :  { %8 = sst [smem:[#allocation3]] %s1617_s2 }
   0x2   :  { %9 = vsyncpa [#allocation5], 0 }
   0x3   :  { %11 = vsyncpa [#allocation5 + $0x1], 0 }
   0x4   :  { %12 = vsyncpa [#allocation7], 0  ;;  %s1138_s14 = smov 0   ;;  %s1140_s15 = smov 0  }
   0x5   :  { %s1142_s16 = smov 0   ;;  %s1144_s17 = smov 0  }
   0x6   :  { %s1146_s18 = smov 0   ;;  %s1148_s19 = smov 0  }
   0x7 LB: > { %s903_s2 = sadd.s32 4294967295, %s1109_s19   ;;  %s39_s20 = sadd.s32 1, %s1097_s16  ;;  %s1109_s19 = sphi %s1148_s19, %s18_s19   ;;  %s1105_s18 = sphi %s1146_s18, %s1638_s18   ;;  %s1101_s17 = sphi %s1144_s17, %s1637_s17   ;;  %s1097_s16 = sphi %s1142_s16, %s1636_s16   ;;  %s1093_s15 = sphi %s1140_s15, %s1635_s15   ;;  %s1089_s14 = sphi %s1138_s14, %s1634_s14  }
   0x8   : > { %p46_p0 = scmp.ne.s32.totalorder %s1097_s16, %s1093_s15  ;;  %p47_p1 = scmp.eq.s32.totalorder %s1109_s19, 0 }
   0x9   : > { %p52_p2 = scmp.ne.s32.totalorder %s1093_s15, %s1089_s14  ;;  %p1172_p3 = scmp.eq.s32.totalorder %s903_s2, 0 }
   0xa   : > { %p48_p4 = por %p47_p1, %p46_p0  ;;  %p905_p5 = scmp.ge.s32.totalorder %s1109_s19, 1 }
   0xb   : > { %s1624_s21 = scalar_select %p1172_p3, 1, 0 }
   0xc   : > { %p1179_p6 = por %p1172_p3, %p52_p2  ;;  %p136_p7 = scmp.lt.s32.totalorder %s1109_s19, 3 }
   0xd   : > { %s1111_s24 = smov [#allocation6]   ;;  %p944_p10 = scmp.lt.s32.totalorder %s1109_s19, 2 }
   0xe   : > { %s1625_s22 = scalar_select %p1179_p6, 1, 0 }
   0xf   : > { %p1184_p8 = pnand %p905_p5, %p136_p7  ;;  %s152_s25 = sshll.u32 %s1111_s24, 4  ;;  %s153_s25 = int_to_ptr.vmem [resolvable:$true] %s152_s25 }
  0x10   : > { %s166_s26 = sand.u32 1, %s1097_s16   ;;  %p1198_p12 = pnand %p944_p10, %p48_p4 }
  0x11   : > { %s1626_s23 = scalar_select %p1184_p8, 1, 0 }
  0x12   : > { %p935_p9 = pneg %p1184_p8  ;;  %s997_s4 = scalar_lea.hbm %s1616_s1, 128 }
  0x13   : > { %s1628_s28 = scalar_select %p1198_p12, 1, 0 }
  0x14   : > { %p1194_p11 = pnand %p935_p9, %p1172_p3  ;;  %p998_p13 = scmp.ne.s32.totalorder %s1616_s1, %s997_s4 }
  0x15   : > { %p1004_p5 = scmp.lt.u32.totalorder %s997_s4, %s1616_s1 }
  0x16   : > { %p999_p0 = pneg %p1194_p11 }
  0x18   : > { %p1000_p1 = pnand %p999_p0, %p998_p13 }
  0x1a   : > { %p1001_p2 = pneg %p1000_p1 }
  0x1c   : > { %p1006_p4 = pnand %p1004_p5, %p1001_p2 }
  0x1e   : > { %1009 = shalt.err (!%p1006_p4)
}
  0x1f   : > { %s1010_s9 = scalar_lea.vmem %s153_s25, 128  ;;  %p1018_p3 = scmp.lt.s32.totalorder %s153_s25, %s153_s25 }
  0x20   : > { %p1011_p7 = scmp.ne.s32.totalorder %s153_s25, %s1010_s9  ;;  %p1019_p6 = scmp.lt.s32.totalorder %s1010_s9, %s1010_s9 }
  0x22   : > { %p1013_p9 = pnand %p1011_p7, %p999_p0  ;;  %p1020_p8 = por %p1019_p6, %p1018_p3 }
  0x24   : > { %p1014_p10 = pneg %p1013_p9 }
  0x26   : > { %p1021_p12 = pnand %p1020_p8, %p1014_p10 }
  0x28   : > { %1024 = shalt.err (!%p1021_p12)
}
  0x29   : > { %938 = dma.hbm_to_vmem [thread:$0]  (!%p1194_p11), %s1616_s1, 128, %s153_s25, [#allocation7]  }
  0x2a   : > { %s30_s12 = sadd.s32 1, %s1105_s18  ;;  %s908_s13 = sshll.u32 %s166_s26, 10 }
  0x2b   : > { %p32_p13 = scmp.ge.s32.totalorder %s30_s12, 2  ;;  %s928_s14 = sshll.u32 %s1105_s18, 14 }
  0x2c   : > { %s170_s2 = scalar_lea.vmem [#allocation4], %s908_s13  ;;  %s1227_s30 = scalar_lea.hbm %s1615_s0, %s928_s14 }
  0x2d   : > { %s180_s24 = sshll.u32 %s170_s2, 4  ;;  %s1640_s12 = smov (%p32_p13, %s30_s12), 0  ;;  %s1229_s24 = int_to_ptr.vmem [resolvable:$true] %s180_s24 }
  0x2e   : > { %s34_s25 = ssub.s32 %s1105_s18, %s1640_s12  ;;  %s1239_s5 = scalar_lea.sflag [#allocation5], %s166_s26 }
  0x2f   : > { %p1233_p3 = scmp.eq.s32.totalorder %s34_s25, 0  ;;  %s1025_s6 = scalar_lea.hbm %s1227_s30, 16384 }
  0x30   : > { %p1026_p6 = scmp.ne.s32.totalorder %s1227_s30, %s1025_s6  ;;  %p1630_p8 = scmp.ne.s32.totalorder %s1628_s28, 0 }
  0x31   : > { %s1030_s9 = scalar_lea.hbm %s1615_s0, 32768  ;;  %p1031_p1 = scmp.lt.u32.totalorder %s1227_s30, %s1615_s0 }
  0x32   : > { %p1027_p11 = pneg %p1630_p8  ;;  %p1032_p2 = scmp.lt.u32.totalorder %s1030_s9, %s1025_s6 }
  0x33   : > { %p1034_p4 = scmp.lt.u32.totalorder %s1025_s6, %s1227_s30 }
  0x34   : > { %p1028_p12 = pnand %p1027_p11, %p1026_p6  ;;  %p1033_p5 = por %p1032_p2, %p1031_p1 }
  0x36   : > { %p1029_p0 = pneg %p1028_p12  ;;  %p1035_p7 = por %p1034_p4, %p1033_p5 }
  0x38   : > { %p1036_p9 = pnand %p1035_p7, %p1029_p0 }
  0x3a   : > { %1039 = shalt.err (!%p1036_p9)
}
  0x3b   : > { %s1040_s26 = scalar_lea.vmem %s1229_s24, 16384  ;;  %s1112_s13 = smov [#allocation4]  }
  0x3c   : > { %p1041_p10 = scmp.ne.s32.totalorder %s1229_s24, %s1040_s26  ;;  %s1045_s14 = sshll.u32 %s1112_s13, 4  ;;  %s1046_s14 = int_to_ptr.vmem [resolvable:$false] %s1045_s14 }
  0x3d   : > { %s1047_s2 = scalar_lea.vmem %s1046_s14, 32768  ;;  %p1048_p12 = scmp.lt.s32.totalorder %s1229_s24, %s1046_s14 }
  0x3e   : > { %p1043_p13 = pnand %p1041_p10, %p1027_p11  ;;  %p1049_p1 = scmp.lt.s32.totalorder %s1047_s2, %s1040_s26 }
  0x40   : > { %p1044_p6 = pneg %p1043_p13  ;;  %p1050_p2 = por %p1049_p1, %p1048_p12 }
  0x42   : > { %p1051_p5 = pnand %p1050_p2, %p1044_p6 }
  0x44   : > { %1054 = shalt.err (!%p1051_p5)
}
  0x45   : > { %s1113_s27 = smov 1024   ;;  %s1114_s29 = smov 64  }
  0x46   : > { %942 = dma.hbm_to_vmem [thread:$0]  (!%p1630_p8), %s1227_s30, 16384, %s1229_s24, %s1239_s5, %s1113_s27, %s1113_s27, %s1114_s29  }
  0x47   : > { %s1272_s25 = scalar_select %p1233_p3, %s1097_s16, %s39_s20  }
  0x48   : > { %p1631_p11 = scmp.ne.s32.totalorder %s1626_s23, 0 }
  0x49   : > { %s194_s6 = sand.u32 (!%p1631_p11), 1, %s1093_s15   ;;  %p1632_p0 = scmp.ne.s32.totalorder (!%p1631_p11), %s1625_s22, 0 }
  0x4a   : > { %192 = sbr.rel (%p1631_p11) target bundleno = 303 (0x12f), region = 32  ;;  %s913_s7 = sshll.u32 (!%p1631_p11), %s194_s6, 10 }
  0x4b   : > { %s195_s8 = scalar_lea.sflag (!%p1631_p11), [#allocation5], %s194_s6  ;;  %s1277_s9 = scalar_lea.vmem (!%p1631_p11), [#allocation4], %s913_s7 }
  0x51   : > { %1080 = dma.done.wait (%p1632_p0), %s195_s8, 16384  }
  0x52   : > { %1082 = vsyncadd (%p1632_p0), %s195_s8, 4294950912  ;;  %p1633_p8 = scmp.ne.s32.totalorder %s1624_s21, 0 }
  0x54   : > { %1084 = dma.done.wait (%p1633_p8), [#allocation7], 128  }
  0x55   : > { %1086 = vsyncadd (%p1633_p8), [#allocation7], 4294967168  ;;  %v272_v0 = vld [vmem:[%s1277_s9 + $0x80] sm:$0xff]  ;;  %v327_v2 = vld [vmem:[%s1277_s9 + $0x88] sm:$0xff]  ;;  %s915_s20 = sshll.u32 %s1101_s17, 4  ;;  %s777_s21 = sld [smem:[#allocation3]] }
  0x56   : > { %v1288_v1 = vld [vmem:[#allocation6] ss:$0 sm:$0xff]  ;;  %v1292_v4 = vld [vmem:[#allocation6 + $0x1] ss:$0 sm:$0xff]  ;;  %v382_v5 = vld [vmem:[%s1277_s9 + $0x90] sm:$0xff]  ;;  %p229_p3 = scmp.lt.s32.totalorder %s915_s20, 31 }
  0x57   : > { %v295_v3 = vmul.f32 %v1288_v1, %v272_v0  ;;  %v1295_v6 = vld [vmem:[#allocation6 + $0x2] ss:$0 sm:$0xff]  ;;  %v350_v7 = vmul.f32 %v1292_v4, %v327_v2  ;;  %v437_v9 = vld [vmem:[%s1277_s9 + $0x98] sm:$0xff]  ;;  %v1300_v10 = vld [vmem:[#allocation6 + $0x3] ss:$0 sm:$0xff]  ;;  %vm795_vm0 = vcmask 7168  }
  0x58   : > { %v405_v8 = vmul.f32 %v1295_v6, %v382_v5  ;;  %v492_v11 = vld [vmem:[%s1277_s9 + $0xa0] sm:$0xff]  ;;  %v547_v13 = vld [vmem:[%s1277_s9 + $0xa8] sm:$0xff]  ;;  %v460_v16 = vmul.f32 %v1300_v10, %v437_v9  ;;  %v602_v17 = vld [vmem:[%s1277_s9 + $0xb0] sm:$0xff]  ;;  %s1642_s20 = smov (!%p229_p3, %s915_s20), 31 }
  0x59   : > { %v1303_v12 = vld [vmem:[#allocation6 + $0x4] ss:$0 sm:$0xff]  ;;  %v1306_v14 = vld [vmem:[#allocation6 + $0x5] ss:$0 sm:$0xff]  ;;  %v366_v15 = vadd.f32 %v350_v7, %v295_v3  ;;  %v1310_v18 = vld [vmem:[#allocation6 + $0x6] ss:$0 sm:$0xff] }
  0x5a   : > { %v657_v19 = vld [vmem:[%s1277_s9 + $0xb8] sm:$0xff]  ;;  %v1313_v20 = vld [vmem:[#allocation6 + $0x7] ss:$0 sm:$0xff]  ;;  %v325_v22 = vld [vmem:[%s1277_s9 + $0x8] sm:$0xff]  ;;  %v515_v24 = vmul.f32 %v1303_v12, %v492_v11  ;;  %v570_v30 = vmul.f32 %v1306_v14, %v547_v13  ;;  %v625_v36 = vmul.f32 %v1310_v18, %v602_v17  ;;  %s916_s22 = sshll.u32 %s1642_s20, 3 }
  0x5b   : > { %v270_v21 = vld [vmem:[%s1277_s9] sm:$0xff]  ;;  %v421_v23 = vadd.f32 %v405_v8, %v366_v15  ;;  %v348_v26 = vmul.f32 %v1292_v4, %v325_v22  ;;  %v380_v27 = vld [vmem:[%s1277_s9 + $0x10] sm:$0xff]  ;;  %v435_v28 = vld [vmem:[%s1277_s9 + $0x18] sm:$0xff]  ;;  %v680_v42 = vmul.f32 %v1313_v20, %v657_v19  ;;  %s1563_s24 = scalar_lea.vmem %s1618_s3, %s916_s22 }
  0x5c   : > { %v293_v25 = vmul.f32 %v1288_v1, %v270_v21  ;;  %v490_v29 = vld [vmem:[%s1277_s9 + $0x20] sm:$0xff]  ;;  %v403_v31 = vmul.f32 %v1295_v6, %v380_v27  ;;  %v545_v32 = vld [vmem:[%s1277_s9 + $0x28] sm:$0xff]  ;;  %v600_v33 = vld [vmem:[%s1277_s9 + $0x30] sm:$0xff]  ;;  %v458_v38 = vmul.f32 %v1300_v10, %v435_v28 }
  0x5d   : > { %v655_v34 = vld [vmem:[%s1277_s9 + $0x38] sm:$0xff]  ;;  %v476_v35 = vadd.f32 %v460_v16, %v421_v23  ;;  %v273_v39 = vld [vmem:[%s1277_s9 + $0xc0] sm:$0xff]  ;;  %v328_v40 = vld [vmem:[%s1277_s9 + $0xc8] sm:$0xff]  ;;  %v513_v49 = vmul.f32 %v1303_v12, %v490_v29  ;;  %v568_v50 = vmul.f32 %v1306_v14, %v545_v32  ;;  %v623_v54 = vmul.f32 %v1310_v18, %v600_v33 }
  0x5e   : > { %v364_v37 = vadd.f32 %v348_v26, %v293_v25  ;;  %v383_v41 = vld [vmem:[%s1277_s9 + $0xd0] sm:$0xff]  ;;  %v296_v43 = vmul.f32 %v1288_v1, %v273_v39  ;;  %v351_v44 = vmul.f32 %v1292_v4, %v328_v40  ;;  %v438_v46 = vld [vmem:[%s1277_s9 + $0xd8] sm:$0xff]  ;;  %v493_v51 = vld [vmem:[%s1277_s9 + $0xe0] sm:$0xff]  ;;  %v678_v55 = vmul.f32 %v1313_v20, %v655_v34 }
  0x5f   : > { %v406_v45 = vmul.f32 %v1295_v6, %v383_v41  ;;  %v531_v47 = vadd.f32 %v515_v24, %v476_v35  ;;  %v548_v52 = vld [vmem:[%s1277_s9 + $0xe8] sm:$0xff]  ;;  %v271_v53 = vld [vmem:[%s1277_s9 + $0x40] sm:$0xff]  ;;  %v461_v57 = vmul.f32 %v1300_v10, %v438_v46  ;;  %v381_v59 = vld [vmem:[%s1277_s9 + $0x50] sm:$0xff]  ;;  %v516_v7 = vmul.f32 %v1303_v12, %v493_v51 }
  0x60   : > { %v419_v48 = vadd.f32 %v403_v31, %v364_v37  ;;  %v367_v56 = vadd.f32 %v351_v44, %v296_v43  ;;  %v326_v58 = vld [vmem:[%s1277_s9 + $0x48] sm:$0xff]  ;;  %v436_v60 = vld [vmem:[%s1277_s9 + $0x58] sm:$0xff]  ;;  %v603_v63 = vld [vmem:[%s1277_s9 + $0xf0] sm:$0xff]  ;;  %v294_v0 = vmul.f32 %v1288_v1, %v271_v53  ;;  %v571_v8 = vmul.f32 %v1306_v14, %v548_v52 }
  0x61   : > { %v586_v61 = vadd.f32 %v570_v30, %v531_v47  ;;  %v349_v2 = vmul.f32 %v1292_v4, %v326_v58  ;;  %v491_v3 = vld [vmem:[%s1277_s9 + $0x60] sm:$0xff]  ;;  %v404_v9 = vmul.f32 %v1295_v6, %v381_v59  ;;  %v330_v13 = vld [vmem:[%s1277_s9 + $0x148] sm:$0xff]  ;;  %v658_v17 = vld [vmem:[%s1277_s9 + $0xf8] sm:$0xff]  ;;  %v459_v21 = vmul.f32 %v1300_v10, %v436_v60 }
  0x62   : > { %v474_v62 = vadd.f32 %v458_v38, %v419_v48  ;;  %v422_v5 = vadd.f32 %v406_v45, %v367_v56  ;;  %v275_v11 = vld [vmem:[%s1277_s9 + $0x140] sm:$0xff]  ;;  %v546_v22 = vld [vmem:[%s1277_s9 + $0x68] sm:$0xff]  ;;  %v385_v23 = vld [vmem:[%s1277_s9 + $0x150] sm:$0xff]  ;;  %v626_v25 = vmul.f32 %v1310_v18, %v603_v63  ;;  %v514_v26 = vmul.f32 %v1303_v12, %v491_v3 }
  0x63   : > { %v641_v15 = vadd.f32 %v625_v36, %v586_v61  ;;  %v365_v19 = vadd.f32 %v349_v2, %v294_v0  ;;  %v298_v27 = vmul.f32 %v1288_v1, %v275_v11  ;;  %v440_v28 = vld [vmem:[%s1277_s9 + $0x158] sm:$0xff]  ;;  %v601_v32 = vld [vmem:[%s1277_s9 + $0x70] sm:$0xff]  ;;  %v353_v33 = vmul.f32 %v1292_v4, %v330_v13  ;;  %v495_v34 = vld [vmem:[%s1277_s9 + $0x160] sm:$0xff] }
  0x64   : > { %v529_v16 = vadd.f32 %v513_v49, %v474_v62  ;;  %v477_v24 = vadd.f32 %v461_v57, %v422_v5  ;;  %v274_v35 = vld [vmem:[%s1277_s9 + $0x100] sm:$0xff]  ;;  %v681_v37 = vmul.f32 %v1313_v20, %v658_v17  ;;  %v569_v38 = vmul.f32 %v1306_v14, %v546_v22  ;;  %v329_v40 = vld [vmem:[%s1277_s9 + $0x108] sm:$0xff]  ;;  %v656_v43 = vld [vmem:[%s1277_s9 + $0x78] sm:$0xff] }
  0x65   : > { %v696_v29 = vadd.f32 %v680_v42, %v641_v15  ;;  %v420_v31 = vadd.f32 %v404_v9, %v365_v19  ;;  %v408_v39 = vmul.f32 %v1295_v6, %v385_v23  ;;  %v369_v44 = vadd.f32 %v353_v33, %v298_v27  ;;  %v550_v46 = vld [vmem:[%s1277_s9 + $0x168] sm:$0xff]  ;;  %v384_v47 = vld [vmem:[%s1277_s9 + $0x110] sm:$0xff]  ;;  %v439_v52 = vld [vmem:[%s1277_s9 + $0x118] sm:$0xff] }
  0x66   : > { %v584_v30 = vadd.f32 %v568_v50, %v529_v16  ;;  %v532_v36 = vadd.f32 %v516_v7, %v477_v24  ;;  %v463_v45 = vmul.f32 %v1300_v10, %v440_v28  ;;  %v624_v49 = vmul.f32 %v1310_v18, %v601_v32  ;;  %v605_v57 = vld [vmem:[%s1277_s9 + $0x170] sm:$0xff]  ;;  %v494_v59 = vld [vmem:[%s1277_s9 + $0x120] sm:$0xff]  ;;  %v660_v0 = vld [vmem:[%s1277_s9 + $0x178] sm:$0xff] }
  0x67   : > { %749 = vadd.xlane.f32.xlu1 %v696_v29  ;;  %v475_v42 = vadd.f32 %v459_v21, %v420_v31  ;;  %v518_v50 = vmul.f32 %v1303_v12, %v495_v34  ;;  %v297_v51 = vmul.f32 %v1288_v1, %v274_v35  ;;  %v424_v56 = vadd.f32 %v408_v39, %v369_v44  ;;  %v277_v60 = vld [vmem:[%s1277_s9 + $0x1c0] sm:$0xff]  ;;  %v549_v9 = vld [vmem:[%s1277_s9 + $0x128] sm:$0xff]  ;;  %v387_v11 = vld [vmem:[%s1277_s9 + $0x1d0] sm:$0xff] }
  0x68   : > { %v639_v41 = vadd.f32 %v623_v54, %v584_v30  ;;  %v587_v48 = vadd.f32 %v571_v8, %v532_v36  ;;  %v352_v58 = vmul.f32 %v1292_v4, %v329_v40  ;;  %v679_v62 = vmul.f32 %v1313_v20, %v656_v43  ;;  %v442_v13 = vld [vmem:[%s1277_s9 + $0x1d8] sm:$0xff]  ;;  %v604_v19 = vld [vmem:[%s1277_s9 + $0x130] sm:$0xff]  ;;  %v276_v27 = vld [vmem:[%s1277_s9 + $0x180] sm:$0xff] }
  0x69   : > { %v530_v54 = vadd.f32 %v514_v26, %v475_v42  ;;  %v573_v63 = vmul.f32 %v1306_v14, %v550_v46  ;;  %v407_v2 = vmul.f32 %v1295_v6, %v384_v47  ;;  %v479_v5 = vadd.f32 %v463_v45, %v424_v56  ;;  %v497_v26 = vld [vmem:[%s1277_s9 + $0x1e0] sm:$0xff]  ;;  %v331_v28 = vld [vmem:[%s1277_s9 + $0x188] sm:$0xff]  ;;  %v386_v33 = vld [vmem:[%s1277_s9 + $0x190] sm:$0xff] }
  0x6a   : > { %v694_v53 = vadd.f32 %v678_v55, %v639_v41  ;;  %v642_v61 = vadd.f32 %v626_v25, %v587_v48  ;;  %v332_v55 = vld [vmem:[%s1277_s9 + $0x1c8] sm:$0xff]  ;;  %v368_v7 = vadd.f32 %v352_v58, %v297_v51  ;;  %v462_v8 = vmul.f32 %v1300_v10, %v439_v52  ;;  %v441_v40 = vld [vmem:[%s1277_s9 + $0x198] sm:$0xff]  ;;  %v607_v43 = vld [vmem:[%s1277_s9 + $0x1f0] sm:$0xff] }
  0x6b   : > { %v585_v3 = vadd.f32 %v569_v38, %v530_v54  ;;  %v628_v16 = vmul.f32 %v1310_v18, %v605_v57  ;;  %v517_v17 = vmul.f32 %v1303_v12, %v494_v59  ;;  %v300_v21 = vmul.f32 %v1288_v1, %v277_v60  ;;  %v552_v39 = vld [vmem:[%s1277_s9 + $0x1e8] sm:$0xff]  ;;  %v279_v51 = vld [vmem:[%s1277_s9 + $0x240] sm:$0xff]  ;;  %v662_v56 = vld [vmem:[%s1277_s9 + $0x1f8] sm:$0xff] }
  0x6c   : > { %745 = vadd.xlane.f32.xlu0 %v694_v53  ;;  %v697_v15 = vadd.f32 %v681_v37, %v642_v61  ;;  %v534_v23 = vadd.f32 %v518_v50, %v479_v5  ;;  %v423_v24 = vadd.f32 %v407_v2, %v368_v7  ;;  %v355_v25 = vmul.f32 %v1292_v4, %v332_v55  ;;  %v659_v37 = vld [vmem:[%s1277_s9 + $0x138] sm:$0xff]  ;;  %v496_v50 = vld [vmem:[%s1277_s9 + $0x1a0] sm:$0xff]  ;;  %v334_v52 = vld [vmem:[%s1277_s9 + $0x248] sm:$0xff] }
  0x6d   : > { %v640_v22 = vadd.f32 %v624_v49, %v585_v3  ;;  %v683_v29 = vmul.f32 %v1313_v20, %v660_v0  ;;  %v572_v30 = vmul.f32 %v1306_v14, %v549_v9  ;;  %v410_v31 = vmul.f32 %v1295_v6, %v387_v11  ;;  %v389_v59 = vld [vmem:[%s1277_s9 + $0x250] sm:$0xff]  ;;  %v551_v0 = vld [vmem:[%s1277_s9 + $0x1a8] sm:$0xff]  ;;  %v444_v2 = vld [vmem:[%s1277_s9 + $0x258] sm:$0xff] }
  0x6e   : > { %751 = vadd.xlane.f32.xlu1 %v697_v15  ;;  %v465_v32 = vmul.f32 %v1300_v10, %v442_v13  ;;  %v589_v35 = vadd.f32 %v573_v63, %v534_v23  ;;  %v478_v36 = vadd.f32 %v462_v8, %v423_v24  ;;  %v371_v38 = vadd.f32 %v355_v25, %v300_v21  ;;  %v606_v5 = vld [vmem:[%s1277_s9 + $0x1b0] sm:$0xff]  ;;  %v499_v9 = vld [vmem:[%s1277_s9 + $0x260] sm:$0xff]  ;;  %v661_v23 = vld [vmem:[%s1277_s9 + $0x1b8] sm:$0xff] }
  0x6f   : > { %v695_v34 = vadd.f32 %v679_v62, %v640_v22  ;;  %v627_v41 = vmul.f32 %v1310_v18, %v604_v19  ;;  %v520_v42 = vmul.f32 %v1303_v12, %v497_v26  ;;  %v299_v44 = vmul.f32 %v1288_v1, %v276_v27  ;;  %v333_v19 = vld [vmem:[%s1277_s9 + $0x208] sm:$0xff]  ;;  %v388_v27 = vld [vmem:[%s1277_s9 + $0x210] sm:$0xff] }
  0x70   : > { %v354_v45 = vmul.f32 %v1292_v4, %v331_v28  ;;  %v644_v46 = vadd.f32 %v628_v16, %v589_v35  ;;  %v533_v47 = vadd.f32 %v517_v17, %v478_v36  ;;  %v426_v48 = vadd.f32 %v410_v31, %v371_v38  ;;  %v278_v17 = vld [vmem:[%s1277_s9 + $0x200] sm:$0xff]  ;;  %v554_v26 = vld [vmem:[%s1277_s9 + $0x268] sm:$0xff]  ;;  %v609_v35 = vld [vmem:[%s1277_s9 + $0x270] sm:$0xff] }
  0x71   : > { %747 = vadd.xlane.f32.xlu0 %v695_v34  ;;  %v409_v49 = vmul.f32 %v1295_v6, %v386_v33  ;;  %v682_v53 = vmul.f32 %v1313_v20, %v659_v37  ;;  %v575_v54 = vmul.f32 %v1306_v14, %v552_v39  ;;  %v464_v58 = vmul.f32 %v1300_v10, %v441_v40  ;;  %v498_v38 = vld [vmem:[%s1277_s9 + $0x220] sm:$0xff] }
  0x72   : > { %v370_v57 = vadd.f32 %v354_v45, %v299_v44  ;;  %v699_v60 = vadd.f32 %v683_v29, %v644_v46  ;;  %v588_v61 = vadd.f32 %v572_v30, %v533_v47  ;;  %v481_v62 = vadd.f32 %v465_v32, %v426_v48  ;;  %v443_v32 = vld [vmem:[%s1277_s9 + $0x218] sm:$0xff]  ;;  %v281_v39 = vld [vmem:[%s1277_s9 + $0x2c0] sm:$0xff]  ;;  %v336_v45 = vld [vmem:[%s1277_s9 + $0x2c8] sm:$0xff] }
  0x73   : > { %v630_v63 = vmul.f32 %v1310_v18, %v607_v43  ;;  %v519_v3 = vmul.f32 %v1303_v12, %v496_v50  ;;  %v302_v7 = vmul.f32 %v1288_v1, %v279_v51  ;;  %v357_v8 = vmul.f32 %v1292_v4, %v334_v52  ;;  %v664_v43 = vld [vmem:[%s1277_s9 + $0x278] sm:$0xff]  ;;  %v553_v50 = vld [vmem:[%s1277_s9 + $0x228] sm:$0xff]  ;;  %v391_v51 = vld [vmem:[%s1277_s9 + $0x2d0] sm:$0xff] }
  0x74   : > { %v425_v55 = vadd.f32 %v409_v49, %v370_v57  ;;  %755 = vadd.xlane.f32.xlu1 %v699_v60  ;;  %v643_v11 = vadd.f32 %v627_v41, %v588_v61  ;;  %v536_v13 = vadd.f32 %v520_v42, %v481_v62  ;;  %v685_v15 = vmul.f32 %v1313_v20, %v662_v56  ;;  %v446_v52 = vld [vmem:[%s1277_s9 + $0x2d8] sm:$0xff]  ;;  %v608_v57 = vld [vmem:[%s1277_s9 + $0x230] sm:$0xff] }
  0x75   : > { %v412_v16 = vmul.f32 %v1295_v6, %v389_v59  ;;  %v574_v22 = vmul.f32 %v1306_v14, %v551_v0  ;;  %v373_v24 = vadd.f32 %v357_v8, %v302_v7  ;;  %v467_v25 = vmul.f32 %v1300_v10, %v444_v2  ;;  %v280_v0 = vld [vmem:[%s1277_s9 + $0x280] sm:$0xff]  ;;  %v335_v2 = vld [vmem:[%s1277_s9 + $0x288] sm:$0xff]  ;;  %v390_v8 = vld [vmem:[%s1277_s9 + $0x290] sm:$0xff] }
  0x76   : > { %v480_v21 = vadd.f32 %v464_v58, %v425_v55  ;;  %v698_v28 = vadd.f32 %v682_v53, %v643_v11  ;;  %v591_v29 = vadd.f32 %v575_v54, %v536_v13  ;;  %v629_v30 = vmul.f32 %v1310_v18, %v606_v5 }
  0x77   : > { %v522_v31 = vmul.f32 %v1303_v12, %v499_v9  ;;  %v428_v34 = vadd.f32 %v412_v16, %v373_v24  ;;  %v301_v36 = vmul.f32 %v1288_v1, %v278_v17  ;;  %v356_v37 = vmul.f32 %v1292_v4, %v333_v19  ;;  %v556_v17 = vld [vmem:[%s1277_s9 + $0x2e8] sm:$0xff]  ;;  %v445_v19 = vld [vmem:[%s1277_s9 + $0x298] sm:$0xff] }
  0x78   : > { %v535_v33 = vadd.f32 %v519_v3, %v480_v21  ;;  %753 = vadd.xlane.f32.xlu0 %v698_v28  ;;  %v646_v40 = vadd.f32 %v630_v63, %v591_v29  ;;  %v684_v41 = vmul.f32 %v1313_v20, %v661_v23  ;;  %v577_v42 = vmul.f32 %v1306_v14, %v554_v26  ;;  %v501_v63 = vld [vmem:[%s1277_s9 + $0x2e0] sm:$0xff]  ;;  %v611_v23 = vld [vmem:[%s1277_s9 + $0x2f0] sm:$0xff] }
  0x79   : > { %v411_v44 = vmul.f32 %v1295_v6, %v388_v27  ;;  %v483_v47 = vadd.f32 %v467_v25, %v428_v34  ;;  %v372_v48 = vadd.f32 %v356_v37, %v301_v36  ;;  %v466_v49 = vmul.f32 %v1300_v10, %v443_v32  ;;  %v338_v32 = vld [vmem:[%s1277_s9 + $0x348] sm:$0xff] }
  0x7a   : > { %v590_v46 = vadd.f32 %v574_v22, %v535_v33  ;;  %v701_v53 = vadd.f32 %v685_v15, %v646_v40  ;;  %v632_v54 = vmul.f32 %v1310_v18, %v609_v35  ;;  %v521_v56 = vmul.f32 %v1303_v12, %v498_v38  ;;  %v663_v15 = vld [vmem:[%s1277_s9 + $0x238] sm:$0xff]  ;;  %v393_v38 = vld [vmem:[%s1277_s9 + $0x350] sm:$0xff] }
  0x7b   : > { %v304_v58 = vmul.f32 %v1288_v1, %v281_v39  ;;  %v538_v60 = vadd.f32 %v522_v31, %v483_v47  ;;  %v427_v61 = vadd.f32 %v411_v44, %v372_v48  ;;  %v359_v62 = vmul.f32 %v1292_v4, %v336_v45  ;;  %v283_v31 = vld [vmem:[%s1277_s9 + $0x340] sm:$0xff]  ;;  %v666_v35 = vld [vmem:[%s1277_s9 + $0x2f8] sm:$0xff]  ;;  %v610_v47 = vld [vmem:[%s1277_s9 + $0x2b0] sm:$0xff] }
  0x7c   : > { %v645_v59 = vadd.f32 %v629_v30, %v590_v46  ;;  %759 = vadd.xlane.f32.xlu1 %v701_v53  ;;  %v687_v55 = vmul.f32 %v1313_v20, %v664_v43  ;;  %v576_v3 = vmul.f32 %v1306_v14, %v553_v50  ;;  %v414_v5 = vmul.f32 %v1295_v6, %v391_v51  ;;  %v500_v30 = vld [vmem:[%s1277_s9 + $0x2a0] sm:$0xff]  ;;  %v555_v43 = vld [vmem:[%s1277_s9 + $0x2a8] sm:$0xff]  ;;  %v448_v44 = vld [vmem:[%s1277_s9 + $0x358] sm:$0xff] }
  0x7d   : > { %v469_v7 = vmul.f32 %v1300_v10, %v446_v52  ;;  %v593_v11 = vadd.f32 %v577_v42, %v538_v60  ;;  %v482_v13 = vadd.f32 %v466_v49, %v427_v61  ;;  %v375_v16 = vadd.f32 %v359_v62, %v304_v58  ;;  %v503_v50 = vld [vmem:[%s1277_s9 + $0x360] sm:$0xff]  ;;  %v665_v60 = vld [vmem:[%s1277_s9 + $0x2b8] sm:$0xff] }
  0x7e   : > { %v700_v9 = vadd.f32 %v684_v41, %v645_v59  ;;  %v631_v21 = vmul.f32 %v1310_v18, %v608_v57  ;;  %v524_v22 = vmul.f32 %v1303_v12, %v501_v63  ;;  %v303_v24 = vmul.f32 %v1288_v1, %v280_v0  ;;  %v337_v57 = vld [vmem:[%s1277_s9 + $0x308] sm:$0xff]  ;;  %v392_v0 = vld [vmem:[%s1277_s9 + $0x310] sm:$0xff] }
  0x7f   : > { %v358_v25 = vmul.f32 %v1292_v4, %v335_v2  ;;  %v648_v26 = vadd.f32 %v632_v54, %v593_v11  ;;  %v537_v27 = vadd.f32 %v521_v56, %v482_v13  ;;  %v430_v28 = vadd.f32 %v414_v5, %v375_v16  ;;  %v282_v56 = vld [vmem:[%s1277_s9 + $0x300] sm:$0xff]  ;;  %v558_v63 = vld [vmem:[%s1277_s9 + $0x368] sm:$0xff]  ;;  %v613_v11 = vld [vmem:[%s1277_s9 + $0x370] sm:$0xff] }
  0x80   : > { %757 = vadd.xlane.f32.xlu0 %v700_v9  ;;  %v413_v29 = vmul.f32 %v1295_v6, %v390_v8  ;;  %v686_v33 = vmul.f32 %v1313_v20, %v663_v15  ;;  %v579_v34 = vmul.f32 %v1306_v14, %v556_v17  ;;  %v468_v37 = vmul.f32 %v1300_v10, %v445_v19  ;;  %v502_v16 = vld [vmem:[%s1277_s9 + $0x320] sm:$0xff] }
  0x81   : > { %v374_v36 = vadd.f32 %v358_v25, %v303_v24  ;;  %v703_v39 = vadd.f32 %v687_v55, %v648_v26  ;;  %v592_v40 = vadd.f32 %v576_v3, %v537_v27  ;;  %v485_v41 = vadd.f32 %v469_v7, %v430_v28  ;;  %v447_v7 = vld [vmem:[%s1277_s9 + $0x318] sm:$0xff]  ;;  %v285_v17 = vld [vmem:[%s1277_s9 + $0x3c0] sm:$0xff]  ;;  %v340_v25 = vld [vmem:[%s1277_s9 + $0x3c8] sm:$0xff] }
  0x82   : > { %v634_v42 = vmul.f32 %v1310_v18, %v611_v23  ;;  %v523_v46 = vmul.f32 %v1303_v12, %v500_v30  ;;  %v306_v48 = vmul.f32 %v1288_v1, %v283_v31  ;;  %v361_v49 = vmul.f32 %v1292_v4, %v338_v32  ;;  %v668_v23 = vld [vmem:[%s1277_s9 + $0x378] sm:$0xff]  ;;  %v557_v30 = vld [vmem:[%s1277_s9 + $0x328] sm:$0xff]  ;;  %v395_v31 = vld [vmem:[%s1277_s9 + $0x3d0] sm:$0xff] }
  0x83   : > { %v429_v45 = vadd.f32 %v413_v29, %v374_v36  ;;  %763 = vadd.xlane.f32.xlu1 %v703_v39  ;;  %v647_v51 = vadd.f32 %v631_v21, %v592_v40  ;;  %v540_v52 = vadd.f32 %v524_v22, %v485_v41  ;;  %v689_v53 = vmul.f32 %v1313_v20, %v666_v35  ;;  %v450_v32 = vld [vmem:[%s1277_s9 + $0x3d8] sm:$0xff]  ;;  %v612_v36 = vld [vmem:[%s1277_s9 + $0x330] sm:$0xff] }
  0x84   : > { %v416_v54 = vmul.f32 %v1295_v6, %v393_v38  ;;  %v578_v59 = vmul.f32 %v1306_v14, %v555_v43  ;;  %v377_v61 = vadd.f32 %v361_v49, %v306_v48  ;;  %v471_v62 = vmul.f32 %v1300_v10, %v448_v44  ;;  %v284_v43 = vld [vmem:[%s1277_s9 + $0x380] sm:$0xff]  ;;  %v339_v44 = vld [vmem:[%s1277_s9 + $0x388] sm:$0xff]  ;;  %v394_v49 = vld [vmem:[%s1277_s9 + $0x390] sm:$0xff] }
  0x85   : > { %v484_v58 = vadd.f32 %v468_v37, %v429_v45  ;;  %v702_v2 = vadd.f32 %v686_v33, %v647_v51  ;;  %v595_v55 = vadd.f32 %v579_v34, %v540_v52  ;;  %v633_v3 = vmul.f32 %v1310_v18, %v610_v47 }
  0x86   : > { %v526_v5 = vmul.f32 %v1303_v12, %v503_v50  ;;  %v432_v9 = vadd.f32 %v416_v54, %v377_v61  ;;  %v305_v13 = vmul.f32 %v1288_v1, %v282_v56  ;;  %v360_v15 = vmul.f32 %v1292_v4, %v337_v57  ;;  %v449_v56 = vld [vmem:[%s1277_s9 + $0x398] sm:$0xff] }
  0x87   : > { %v539_v8 = vadd.f32 %v523_v46, %v484_v58  ;;  %761 = vadd.xlane.f32.xlu0 %v702_v2  ;;  %v650_v19 = vadd.f32 %v634_v42, %v595_v55  ;;  %v688_v21 = vmul.f32 %v1313_v20, %v665_v60  ;;  %v581_v22 = vmul.f32 %v1306_v14, %v558_v63  ;;  %v505_v42 = vld [vmem:[%s1277_s9 + $0x3e0] sm:$0xff] }
  0x88   : > { %v415_v24 = vmul.f32 %v1295_v6, %v392_v0  ;;  %v487_v27 = vadd.f32 %v471_v62, %v432_v9  ;;  %v376_v28 = vadd.f32 %v360_v15, %v305_v13  ;;  %v470_v29 = vmul.f32 %v1300_v10, %v447_v7  ;;  %v504_v55 = vld [vmem:[%s1277_s9 + $0x3a0] sm:$0xff]  ;;  %v559_v13 = vld [vmem:[%s1277_s9 + $0x3a8] sm:$0xff]  ;;  %v670_v15 = vld [vmem:[%s1277_s9 + $0x3f8] sm:$0xff] }
  0x89   : > { %v594_v26 = vadd.f32 %v578_v59, %v539_v8  ;;  %v705_v33 = vadd.f32 %v689_v53, %v650_v19  ;;  %v636_v34 = vmul.f32 %v1310_v18, %v613_v11  ;;  %v525_v35 = vmul.f32 %v1303_v12, %v502_v16  ;;  %v667_v53 = vld [vmem:[%s1277_s9 + $0x338] sm:$0xff]  ;;  %v560_v59 = vld [vmem:[%s1277_s9 + $0x3e8] sm:$0xff] }
  0x8a   : > { %v308_v37 = vmul.f32 %v1288_v1, %v285_v17  ;;  %v542_v39 = vadd.f32 %v526_v5, %v487_v27  ;;  %v431_v40 = vadd.f32 %v415_v24, %v376_v28  ;;  %v363_v41 = vmul.f32 %v1292_v4, %v340_v25  ;;  %v615_v5 = vld [vmem:[%s1277_s9 + $0x3f0] sm:$0xff]  ;;  %v669_v27 = vld [vmem:[%s1277_s9 + $0x3b8] sm:$0xff] }
  0x8b   : > { %v649_v38 = vadd.f32 %v633_v3, %v594_v26  ;;  %767 = vadd.xlane.f32.xlu1 %v705_v33  ;;  %v691_v45 = vmul.f32 %v1313_v20, %v668_v23  ;;  %v580_v46 = vmul.f32 %v1306_v14, %v557_v30  ;;  %v418_v47 = vmul.f32 %v1295_v6, %v395_v31 }
  0x8c   : > { %v473_v48 = vmul.f32 %v1300_v10, %v450_v32  ;;  %v597_v51 = vadd.f32 %v581_v22, %v542_v39  ;;  %v486_v52 = vadd.f32 %v470_v29, %v431_v40  ;;  %v379_v54 = vadd.f32 %v363_v41, %v308_v37  ;;  %v614_v22 = vld [vmem:[%s1277_s9 + $0x3b0] sm:$0xff] }
  0x8d   : > { %v704_v50 = vadd.f32 %v688_v21, %v649_v38  ;;  %v635_v57 = vmul.f32 %v1310_v18, %v612_v36  ;;  %v528_v58 = vmul.f32 %v1303_v12, %v505_v42  ;;  %v307_v60 = vmul.f32 %v1288_v1, %v284_v43 }
  0x8e   : > { %v362_v61 = vmul.f32 %v1292_v4, %v339_v44  ;;  %v652_v62 = vadd.f32 %v636_v34, %v597_v51  ;;  %v541_v63 = vadd.f32 %v525_v35, %v486_v52  ;;  %v434_v0 = vadd.f32 %v418_v47, %v379_v54 }
  0x8f   : > { %765 = vadd.xlane.f32.xlu0 %v704_v50  ;;  %v417_v2 = vmul.f32 %v1295_v6, %v394_v49  ;;  %v690_v3 = vmul.f32 %v1313_v20, %v667_v53  ;;  %v472_v8 = vmul.f32 %v1300_v10, %v449_v56  ;;  %v583_v4 = vmul.f32 %v1306_v14, %v560_v59 }
  0x90   : > { %v378_v7 = vadd.f32 %v362_v61, %v307_v60  ;;  %v707_v9 = vadd.f32 %v691_v45, %v652_v62  ;;  %v596_v1 = vadd.f32 %v580_v46, %v541_v63  ;;  %v489_v11 = vadd.f32 %v473_v48, %v434_v0 }
  0x91   : > { %v527_v17 = vmul.f32 %v1303_v12, %v504_v55  ;;  %v638_v21 = vmul.f32 %v1310_v18, %v615_v5  ;;  %v582_v10 = vmul.f32 %v1306_v14, %v559_v13  ;;  %v693_v26 = vmul.f32 %v1313_v20, %v670_v15 }
  0x92   : > { %v433_v16 = vadd.f32 %v417_v2, %v378_v7  ;;  %771 = vadd.xlane.f32.xlu1 %v707_v9  ;;  %v651_v6 = vadd.f32 %v635_v57, %v596_v1  ;;  %v544_v19 = vadd.f32 %v528_v58, %v489_v11  ;;  %v637_v29 = vmul.f32 %v1310_v18, %v614_v22 }
  0x93   : > { %v692_v31 = vmul.f32 %v1313_v20, %v669_v27  ;;  %v778_v14 = vstv %s777_s21 }
  0x94   : > { %v488_v23 = vadd.f32 %v472_v8, %v433_v16  ;;  %v706_v24 = vadd.f32 %v690_v3, %v651_v6  ;;  %v599_v25 = vadd.f32 %v583_v4, %v544_v19 }
  0x96   : > { %v543_v28 = vadd.f32 %v527_v17, %v488_v23  ;;  %769 = vadd.xlane.f32.xlu0 %v706_v24  ;;  %v654_v12 = vadd.f32 %v638_v21, %v599_v25 }
  0x98   : > { %v598_v30 = vadd.f32 %v582_v10, %v543_v28  ;;  %v709_v32 = vadd.f32 %v693_v26, %v654_v12 }
  0x9a   : > { %v653_v33 = vadd.f32 %v637_v29, %v598_v30  ;;  %775 = vadd.xlane.f32.xlu1 %v709_v32 }
  0x9c   : > { %v708_v34 = vadd.f32 %v692_v31, %v653_v33 }
  0x9e   : > { %773 = vadd.xlane.f32.xlu0 %v708_v34 }
  0xf4   : > { %v750_v18 = vpop.xlane.xlu1 %749 }
  0xf5   : > { %v781_v20 = vmul.f32 %v778_v14, %v750_v18 }
  0xf7   : > { %798 = vst.msk [vmem:[%s1563_s24 + $0x10] sm:$0xff] %vm795_vm0, %v781_v20 }
  0xf9   : > { %v746_v35 = vpop.xlane.xlu0 %745 }
  0xfa   : > { %v779_v36 = vmul.f32 %v778_v14, %v746_v35 }
  0xfb   : > { %v752_v37 = vpop.xlane.xlu1 %751 }
  0xfc   : > { %796 = vst.msk [vmem:[%s1563_s24] sm:$0xff] %vm795_vm0, %v779_v36  ;;  %v782_v38 = vmul.f32 %v778_v14, %v752_v37 }
  0xfe   : > { %799 = vst.msk [vmem:[%s1563_s24 + $0x18] sm:$0xff] %vm795_vm0, %v782_v38  ;;  %v748_v39 = vpop.xlane.xlu0 %747 }
  0xff   : > { %v780_v40 = vmul.f32 %v778_v14, %v748_v39 }
 0x101   : > { %797 = vst.msk [vmem:[%s1563_s24 + $0x8] sm:$0xff] %vm795_vm0, %v780_v40  ;;  %v756_v41 = vpop.xlane.xlu1 %755 }
 0x102   : > { %v784_v42 = vmul.f32 %v778_v14, %v756_v41 }
 0x104   : > { %801 = vst.msk [vmem:[%s1563_s24 + $0x28] sm:$0xff] %vm795_vm0, %v784_v42 }
 0x105   : > { %v754_v43 = vpop.xlane.xlu0 %753 }
 0x106   : > { %v783_v44 = vmul.f32 %v778_v14, %v754_v43 }
 0x108   : > { %800 = vst.msk [vmem:[%s1563_s24 + $0x20] sm:$0xff] %vm795_vm0, %v783_v44 }
 0x109   : > { %v760_v45 = vpop.xlane.xlu1 %759 }
 0x10a   : > { %v786_v46 = vmul.f32 %v778_v14, %v760_v45 }
 0x10c   : > { %803 = vst.msk [vmem:[%s1563_s24 + $0x38] sm:$0xff] %vm795_vm0, %v786_v46 }
 0x10d   : > { %v758_v47 = vpop.xlane.xlu0 %757 }
 0x10e   : > { %v785_v48 = vmul.f32 %v778_v14, %v758_v47 }
 0x110   : > { %802 = vst.msk [vmem:[%s1563_s24 + $0x30] sm:$0xff] %vm795_vm0, %v785_v48  ;;  %v764_v49 = vpop.xlane.xlu1 %763 }
 0x111   : > { %v788_v50 = vmul.f32 %v778_v14, %v764_v49 }
 0x113   : > { %805 = vst.msk [vmem:[%s1563_s24 + $0x48] sm:$0xff] %vm795_vm0, %v788_v50 }
 0x114   : > { %v762_v51 = vpop.xlane.xlu0 %761 }
 0x115   : > { %v787_v52 = vmul.f32 %v778_v14, %v762_v51 }
 0x117   : > { %804 = vst.msk [vmem:[%s1563_s24 + $0x40] sm:$0xff] %vm795_vm0, %v787_v52 }
 0x118   : > { %v768_v53 = vpop.xlane.xlu1 %767 }
 0x119   : > { %v790_v54 = vmul.f32 %v778_v14, %v768_v53 }
 0x11b   : > { %807 = vst.msk [vmem:[%s1563_s24 + $0x58] sm:$0xff] %vm795_vm0, %v790_v54 }
 0x11c   : > { %v766_v56 = vpop.xlane.xlu0 %765 }
 0x11d   : > { %v789_v57 = vmul.f32 %v778_v14, %v766_v56 }
 0x11f   : > { %806 = vst.msk [vmem:[%s1563_s24 + $0x50] sm:$0xff] %vm795_vm0, %v789_v57  ;;  %v772_v58 = vpop.xlane.xlu1 %771 }
 0x120   : > { %v792_v59 = vmul.f32 %v778_v14, %v772_v58 }
 0x122   : > { %809 = vst.msk [vmem:[%s1563_s24 + $0x68] sm:$0xff] %vm795_vm0, %v792_v59 }
 0x123   : > { %v770_v60 = vpop.xlane.xlu0 %769 }
 0x124   : > { %v791_v61 = vmul.f32 %v778_v14, %v770_v60 }
 0x126   : > { %808 = vst.msk [vmem:[%s1563_s24 + $0x60] sm:$0xff] %vm795_vm0, %v791_v61 }
 0x127   : > { %v776_v62 = vpop.xlane.xlu1 %775 }
 0x128   : > { %v794_v63 = vmul.f32 %v778_v14, %v776_v62 }
 0x12a   : > { %811 = vst.msk [vmem:[%s1563_s24 + $0x78] sm:$0xff] %vm795_vm0, %v794_v63 }
 0x12b   : > { %v774_v0 = vpop.xlane.xlu0 %773 }
 0x12c   : > { %v793_v2 = vmul.f32 %v778_v14, %v774_v0 }
 0x12e   : > { %810 = vst.msk [vmem:[%s1563_s24 + $0x70] sm:$0xff] %vm795_vm0, %v793_v2 }
 0x12f PF: > { %s18_s19 = sadd.s32 1, %s1109_s19   ;;  %s1634_s14 = smov %s1093_s15 }
 0x130   : > { %p15_p4 = scmp.ge.s32.totalorder %s18_s19, 4   ;;  %s1635_s15 = smov %s1097_s16 }
 0x131   : > { %s1636_s16 = smov %s1272_s25  ;;  %s1637_s17 = smov %s1105_s18 }
 0x132   : > { %s1638_s18 = smov %s1640_s12  ;;  %17 = sbr.rel (!%p15_p4) target bundleno = 7 (0x7), region = 85 }
 0x139   :  { %834 = vsyncpa [#allocation5], 1 }
 0x13a   :  { %836 = vsyncpa [#allocation5 + $0x1], 1 }
 0x13b   :  { %837 = vsyncpa [#allocation7], 1 }

</bundles_post_ra>
